<compile_context>
chip_gen: v6e
topology: v6e:2x2x1
jax: 0.10.0
libtpu: 0.0.40
codegen_flags: <defaults>
</compile_context>

<pallas_src>
import math
import functools
import numpy as np

import jax
import jax.numpy as jnp
from jax import lax
from jax.experimental import pallas as pl
from jax.experimental.pallas import tpu as pltpu


def _round_up(x, m):
    return (x + m - 1) // m * m


# ----------------------------------------------------------------------------
# Pallas kernel: fused 4-corner bilinear sum + conv-as-matmul + BN shift + SiLU
# ----------------------------------------------------------------------------
def _akconv_fused_kernel(a_lt_ref, a_rb_ref, a_lb_ref, a_rt_ref,
                         w_ref, beta_ref, o_ref):
    # Corners arrive pre-weighted by their bilinear coefficient, so the
    # combine is just a sum.  Upcast to f32 in-vreg for the adds (v5e has no
    # bf16 VALU); feed bf16 operands to the MXU with f32 accumulation.
    a = (a_lt_ref[...].astype(jnp.float32) +
         a_rb_ref[...].astype(jnp.float32) +
         a_lb_ref[...].astype(jnp.float32) +
         a_rt_ref[...].astype(jnp.float32))
    acc = jnp.dot(a.astype(jnp.bfloat16), w_ref[...],
                  preferred_element_type=jnp.float32)
    # BatchNorm scale is folded into w; only the shift remains.  Then SiLU.
    y = acc + beta_ref[...]
    o_ref[...] = (y * jax.nn.sigmoid(y)).astype(o_ref.dtype)


def _choose_tm(M, K, OC, tm_target=512, vmem_budget=40 * 1024 * 1024):
    """Largest row tile that fits a conservative (v7x-safe) VMEM budget."""
    def footprint(t):  # double-buffered inputs + weight + shift + output tile
        return 2 * (4 * t * K * 2 + K * OC * 2 + OC * 4 + t * OC * 4)
    tm = tm_target
    while tm > 128 and footprint(tm) > vmem_budget:
        tm //= 2
    tm = min(tm, _round_up(M, 8))
    # keep >= 2 grid steps when the problem allows (v7x has 2 TensorCores)
    if M > 256 and _round_up(M, tm) // tm < 2:
        tm = max(128, _round_up((M + 1) // 2, 8))
    return tm


def akconv_fused(a_lt, a_rb, a_lb, a_rt, w_eff, beta_eff, *, tm=512):
    M, K = a_lt.shape          # K already padded to a multiple of 128
    OC = w_eff.shape[1]        # already padded to a multiple of 128
    tm = _choose_tm(M, K, OC, tm_target=tm)
    M_pad = _round_up(M, tm)
    if M_pad != M:             # zero-pad tail rows (sliced off below)
        pad = ((0, M_pad - M), (0, 0))
        a_lt, a_rb, a_lb, a_rt = tuple(
            jnp.pad(t, pad) for t in (a_lt, a_rb, a_lb, a_rt))

    row_spec = pl.BlockSpec((tm, K), lambda i: (i, 0))
    vmem_bytes = 2 * (4 * tm * K * 2 + K * OC * 2 + OC * 4 + tm * OC * 4)
    vmem_limit = int(min(max(4 * vmem_bytes, 32 << 20), 48 << 20))

    out = pl.pallas_call(
        _akconv_fused_kernel,
        out_shape=jax.ShapeDtypeStruct((M_pad, OC), jnp.float32),
        grid=(M_pad // tm,),
        in_specs=[row_spec, row_spec, row_spec, row_spec,
                  pl.BlockSpec((K, OC), lambda i: (0, 0)),
                  pl.BlockSpec((1, OC), lambda i: (0, 0))],
        out_specs=pl.BlockSpec((tm, OC), lambda i: (i, 0)),
        compiler_params=pltpu.CompilerParams(
            dimension_semantics=("parallel",),
            vmem_limit_bytes=vmem_limit),
    )(a_lt, a_rb, a_lb, a_rt, w_eff, beta_eff)
    return out[:M]


# ----------------------------------------------------------------------------
# Glue (plain JAX): offset conv, sample-point grid, bilinear gather, packing
# ----------------------------------------------------------------------------
def _get_p_n(num_param):
    base_int = round(math.sqrt(num_param))
    row_number = num_param // base_int
    mod_number = num_param % base_int
    xs, ys = np.meshgrid(np.arange(row_number), np.arange(base_int), indexing="ij")
    p_n_x, p_n_y = xs.flatten(), ys.flatten()
    if mod_number > 0:
        mxs, mys = np.meshgrid(np.arange(row_number, row_number + 1),
                               np.arange(mod_number), indexing="ij")
        p_n_x = np.concatenate([p_n_x, mxs.flatten()])
        p_n_y = np.concatenate([p_n_y, mys.flatten()])
    p_n = np.concatenate([p_n_x, p_n_y]).astype(np.float32)
    return jnp.asarray(p_n).reshape(1, 2 * num_param, 1, 1)


def _get_p_0(h, w, num_param, stride):
    i = jnp.arange(h, dtype=jnp.float32) * stride
    j = jnp.arange(w, dtype=jnp.float32) * stride
    p0x = jnp.broadcast_to(i[:, None], (h, w))
    p0y = jnp.broadcast_to(j[None, :], (h, w))
    p0x = jnp.broadcast_to(p0x[None, None], (1, num_param, h, w))
    p0y = jnp.broadcast_to(p0y[None, None], (1, num_param, h, w))
    return jnp.concatenate([p0x, p0y], axis=1)  # (1, 2N, h, w)


@functools.partial(jax.jit, static_argnames=("num_param", "stride",
                                             "use_pallas", "compute_dtype",
                                             "tm"))
def akconv_forward(x, params, *, num_param, stride=1, use_pallas=True,
                   compute_dtype=jnp.bfloat16, tm=512):
    B, C, H, W = x.shape
    Np = num_param

    # offset = p_conv(x): 3x3, pad 1, stride; weight is zero-initialized.
    offset = lax.conv_general_dilated(
        x, params["p_w"], window_strides=(stride, stride),
        padding=((1, 1), (1, 1)),
        dimension_numbers=("NCHW", "OIHW", "NCHW"))
    offset = offset + params["p_b"][None, :, None, None]
    h, w = offset.shape[2], offset.shape[3]

    # sample coordinates p = p_0 + p_n + offset, as (B, h, w, 2N)
    p = _get_p_0(h, w, Np, stride) + _get_p_n(Np) + offset
    p = jnp.transpose(p, (0, 2, 3, 1))

    q_lt = jnp.floor(p)
    q_rb = q_lt + 1.0

    def clip_xy(t):
        return jnp.concatenate(
            [jnp.clip(t[..., :Np], 0, H - 1), jnp.clip(t[..., Np:], 0, W - 1)],
            axis=-1)

    q_lt = clip_xy(q_lt).astype(jnp.int32)
    q_rb = clip_xy(q_rb).astype(jnp.int32)
    q_lb = jnp.concatenate([q_lt[..., :Np], q_rb[..., Np:]], axis=-1)
    q_rt = jnp.concatenate([q_rb[..., :Np], q_lt[..., Np:]], axis=-1)
    p = clip_xy(p)

    px, py = p[..., :Np], p[..., Np:]

    def fx(q):  # x (row) coord of corner, as float
        return q[..., :Np].astype(jnp.float32)

    def fy(q):  # y (col) coord of corner, as float
        return q[..., Np:].astype(jnp.float32)

    g_lt = (1.0 + (fx(q_lt) - px)) * (1.0 + (fy(q_lt) - py))
    g_rb = (1.0 - (fx(q_rb) - px)) * (1.0 - (fy(q_rb) - py))
    g_lb = (1.0 + (fx(q_lb) - px)) * (1.0 - (fy(q_lb) - py))
    g_rt = (1.0 - (fx(q_rt) - px)) * (1.0 + (fy(q_rt) - py))

    # --- gather + bilinear-weight fold + pack to the kernel's (M, K) layout --
    # x is gathered from an (B, H*W, C) view so each sample point yields a
    # contiguous C-vector; K is sample-point-major / channel-minor so the
    # (M, K) rows come out of a pure reshape (no 5-D transpose).
    # TODO(synk): the data-dependent gather has no clean rectangular-DMA
    # BlockSpec equivalent; done with jnp.take_along_axis outside the kernel.
    M = B * h * w
    K = C * Np
    K_pad = _round_up(K, 128)
    x_hwc = jnp.transpose(x, (0, 2, 3, 1)).reshape(B, H * W, C)

    def weighted_rows(q, g):
        idx = (q[..., :Np] * W + q[..., Np:]).reshape(B, h * w * Np, 1)
        xq = jnp.take_along_axis(x_hwc, idx, axis=1)       # (B, h*w*Np, C)
        xq = xq.reshape(B, h, w, Np, C)
        aw = (g[..., None] * xq).astype(compute_dtype)      # fold g here
        aw = aw.reshape(M, K)
        return jnp.pad(aw, ((0, 0), (0, K_pad - K)))

    a_lt = weighted_rows(q_lt, g_lt)
    a_rb = weighted_rows(q_rb, g_rb)
    a_lb = weighted_rows(q_lb, g_lb)
    a_rt = weighted_rows(q_rt, g_rt)

    # conv weight (OC, C, Np, 1) -> (Np*C, OC) matching the K layout; fold the
    # eval-mode BatchNorm scale into it; pad to lane-dense (K_pad, OC_pad).
    # TODO(synk): training-mode BatchNorm (batch statistics) would need a
    # cross-tile reduction pass; eval-mode running stats are used here.
    OC = params["conv_w"].shape[0]
    OC_pad = _round_up(OC, 128)
    gamma_eff = params["bn_gamma"] / jnp.sqrt(params["bn_var"] + 1e-5)
    beta_eff = params["bn_beta"] - params["bn_mean"] * gamma_eff
    w_mat = jnp.transpose(params["conv_w"][..., 0], (2, 1, 0)).reshape(K, OC)
    w_eff = (w_mat * gamma_eff[None, :]).astype(compute_dtype)
    w_eff = jnp.pad(w_eff, ((0, K_pad - K), (0, OC_pad - OC)))
    beta_pad = jnp.pad(beta_eff.reshape(1, OC).astype(jnp.float32),
                       ((0, 0), (0, OC_pad - OC)))

    if use_pallas:
        out_rows = akconv_fused(a_lt, a_rb, a_lb, a_rt, w_eff, beta_pad, tm=tm)
    else:  # pure-JAX reference of the fused hot path (same dtype discipline)
        a = (a_lt.astype(jnp.float32) + a_rb.astype(jnp.float32) +
             a_lb.astype(jnp.float32) + a_rt.astype(jnp.float32))
        y = jnp.dot(a.astype(compute_dtype), w_eff,
                    preferred_element_type=jnp.float32) + beta_pad
        out_rows = y * jax.nn.sigmoid(y)

    out_rows = out_rows[:, :OC]
    return jnp.transpose(out_rows.reshape(B, h, w, OC), (0, 3, 1, 2))


# ----------------------------------------------------------------------------
# Deterministic parameter init (shapes per AKConv.__init__)
# ----------------------------------------------------------------------------
def init_params(key, inc, outc, num_param):
    k1, k2, k3, k4 = jax.random.split(key, 4)
    return {
        # p_conv: Conv2d(inc, 2*num_param, 3, pad=1); weight zero-init per module
        "p_w": jnp.zeros((2 * num_param, inc, 3, 3), jnp.float32),
        "p_b": 0.3 * jax.random.normal(k1, (2 * num_param,), jnp.float32),
        # conv: Conv2d(inc, outc, (num_param,1), stride=(num_param,1), bias=None)
        "conv_w": 0.2 * jax.random.normal(k2, (outc, inc, num_param, 1), jnp.float32),
        # BatchNorm2d(outc)
        "bn_gamma": 1.0 + 0.1 * jax.random.normal(k3, (outc,), jnp.float32),
        "bn_beta": 0.1 * jax.random.normal(k4, (outc,), jnp.float32),
        "bn_mean": jnp.zeros((outc,), jnp.float32),
        "bn_var": jnp.ones((outc,), jnp.float32),
    }


if __name__ == "__main__":
    B, C, H, W = 2, 4, 16, 16
    OUTC, NUM_PARAM, STRIDE = 8, 5, 1

    key = jax.random.PRNGKey(0)
    kx, kp = jax.random.split(key)
    x = jax.random.normal(kx, (B, C, H, W), jnp.float32)
    params = init_params(kp, C, OUTC, NUM_PARAM)

    out = akconv_forward(x, params, num_param=NUM_PARAM, stride=STRIDE,
                         use_pallas=True)
    out = jax.block_until_ready(out)

    # bf16-matched pure-JAX reference of the fused hot path (tight check)
    ref16 = akconv_forward(x, params, num_param=NUM_PARAM, stride=STRIDE,
                           use_pallas=False)
    ref16 = jax.block_until_ready(ref16)
    # full-f32 reference matching the original module's math (loose check)
    ref32 = akconv_forward(x, params, num_param=NUM_PARAM, stride=STRIDE,
                           use_pallas=False, compute_dtype=jnp.float32)
    ref32 = jax.block_until_ready(ref32)

    assert out.shape == (B, OUTC, H, W), out.shape
    assert jnp.allclose(out, ref16, atol=5e-3, rtol=5e-3), \
        float(jnp.max(jnp.abs(out - ref16)))
    assert jnp.allclose(out, ref32, atol=1e-1, rtol=1e-1), \
        float(jnp.max(jnp.abs(out - ref32)))
    print("KERNEL_OK")
</pallas_src>

<mosaic_0001>
module attributes {stable_mosaic.version = 11 : i64} {
  func.func @_akconv_fused_kernel(%arg0: i32, %arg1: memref<256x128xbf16, #tpu.memory_space<vmem>>, %arg2: memref<256x128xbf16, #tpu.memory_space<vmem>>, %arg3: memref<256x128xbf16, #tpu.memory_space<vmem>>, %arg4: memref<256x128xbf16, #tpu.memory_space<vmem>>, %arg5: memref<128x128xbf16, #tpu.memory_space<vmem>>, %arg6: memref<1x128xf32, #tpu.memory_space<vmem>>, %arg7: memref<256x128xf32, #tpu.memory_space<vmem>>) attributes {dimension_semantics = [#tpu.dimension_semantics<parallel>], iteration_bounds = array<i64: 2>, scalar_prefetch = 0 : i64, scratch_operands = 0 : i64, tpu.core_type = #tpu.core_type<tc>, window_params = [{transform_indices = @transform_0, window_bounds = array<i64: 256, 128>}, {transform_indices = @transform_1, window_bounds = array<i64: 256, 128>}, {transform_indices = @transform_2, window_bounds = array<i64: 256, 128>}, {transform_indices = @transform_3, window_bounds = array<i64: 256, 128>}, {pipeline_mode = #tpu.pipeline_mode<synchronous>, transform_indices = @transform_4, window_bounds = array<i64: 128, 128>}, {pipeline_mode = #tpu.pipeline_mode<synchronous>, transform_indices = @transform_5, window_bounds = array<i64: 1, 128>}, {transform_indices = @transform_6, window_bounds = array<i64: 256, 128>}]} {
    %c0 = arith.constant 0 : index
    %c0_0 = arith.constant 0 : index
    %0 = vector.load %arg1[%c0, %c0_0] : memref<256x128xbf16, #tpu.memory_space<vmem>>, vector<256x128xbf16>
    %1 = arith.extf %0 : vector<256x128xbf16> to vector<256x128xf32>
    %c0_1 = arith.constant 0 : index
    %c0_2 = arith.constant 0 : index
    %2 = vector.load %arg2[%c0_1, %c0_2] : memref<256x128xbf16, #tpu.memory_space<vmem>>, vector<256x128xbf16>
    %3 = arith.extf %2 : vector<256x128xbf16> to vector<256x128xf32>
    %4 = arith.addf %1, %3 : vector<256x128xf32>
    %c0_3 = arith.constant 0 : index
    %c0_4 = arith.constant 0 : index
    %5 = vector.load %arg3[%c0_3, %c0_4] : memref<256x128xbf16, #tpu.memory_space<vmem>>, vector<256x128xbf16>
    %6 = arith.extf %5 : vector<256x128xbf16> to vector<256x128xf32>
    %7 = arith.addf %4, %6 : vector<256x128xf32>
    %c0_5 = arith.constant 0 : index
    %c0_6 = arith.constant 0 : index
    %8 = vector.load %arg4[%c0_5, %c0_6] : memref<256x128xbf16, #tpu.memory_space<vmem>>, vector<256x128xbf16>
    %9 = arith.extf %8 : vector<256x128xbf16> to vector<256x128xf32>
    %10 = arith.addf %7, %9 : vector<256x128xf32>
    %11 = arith.truncf %10 : vector<256x128xf32> to vector<256x128xbf16>
    %c0_7 = arith.constant 0 : index
    %c0_8 = arith.constant 0 : index
    %12 = vector.load %arg5[%c0_7, %c0_8] : memref<128x128xbf16, #tpu.memory_space<vmem>>, vector<128x128xbf16>
    %cst = arith.constant dense<0.000000e+00> : vector<256x128xf32>
    %13 = tpu.matmul %11, %12, %cst {dimension_numbers = #tpu.dot_dimension_numbers<[1], [0], [0], [1], [0, 0, 1, 1], [], []>} : vector<256x128xbf16>, vector<128x128xbf16>, vector<256x128xf32> -> vector<256x128xf32>
    %c0_9 = arith.constant 0 : index
    %c0_10 = arith.constant 0 : index
    %14 = vector.load %arg6[%c0_9, %c0_10] : memref<1x128xf32, #tpu.memory_space<vmem>>, vector<1x128xf32>
    %15 = vector.broadcast %14 : vector<1x128xf32> to vector<256x128xf32>
    %16 = arith.addf %13, %15 : vector<256x128xf32>
    %17 = arith.negf %16 : vector<256x128xf32>
    %18 = math.exp %17 : vector<256x128xf32>
    %cst_11 = arith.constant 1.000000e+00 : f32
    %19 = vector.broadcast %cst_11 : f32 to vector<256x128xf32>
    %20 = arith.addf %19, %18 : vector<256x128xf32>
    %21 = arith.divf %19, %20 : vector<256x128xf32>
    %22 = arith.mulf %16, %21 : vector<256x128xf32>
    %c0_12 = arith.constant 0 : index
    %c0_13 = arith.constant 0 : index
    %23 = vector.load %arg7[%c0_12, %c0_13] : memref<256x128xf32, #tpu.memory_space<vmem>>, vector<256x128xf32>
    tpu.vector_store %arg7[%c0_12, %c0_13], %22 {strides = array<i32>} : memref<256x128xf32, #tpu.memory_space<vmem>>, vector<256x128xf32>,
    return
  }
  func.func @transform_0(%arg0: i32) -> (i32, i32) {
    %c0_i32 = arith.constant 0 : i32
    %c0_i32_0 = arith.constant 0 : i32
    return %arg0, %c0_i32 : i32, i32
  }
  func.func @transform_1(%arg0: i32) -> (i32, i32) {
    %c0_i32 = arith.constant 0 : i32
    %c0_i32_0 = arith.constant 0 : i32
    return %arg0, %c0_i32 : i32, i32
  }
  func.func @transform_2(%arg0: i32) -> (i32, i32) {
    %c0_i32 = arith.constant 0 : i32
    %c0_i32_0 = arith.constant 0 : i32
    return %arg0, %c0_i32 : i32, i32
  }
  func.func @transform_3(%arg0: i32) -> (i32, i32) {
    %c0_i32 = arith.constant 0 : i32
    %c0_i32_0 = arith.constant 0 : i32
    return %arg0, %c0_i32 : i32, i32
  }
  func.func @transform_4(%arg0: i32) -> (i32, i32) {
    %c0_i32 = arith.constant 0 : i32
    %c0_i32_0 = arith.constant 0 : i32
    %c0_i32_1 = arith.constant 0 : i32
    return %c0_i32, %c0_i32_0 : i32, i32
  }
  func.func @transform_5(%arg0: i32) -> (i32, i32) {
    %c0_i32 = arith.constant 0 : i32
    %c0_i32_0 = arith.constant 0 : i32
    %c0_i32_1 = arith.constant 0 : i32
    return %c0_i32, %c0_i32_0 : i32, i32
  }
  func.func @transform_6(%arg0: i32) -> (i32, i32) {
    %c0_i32 = arith.constant 0 : i32
    %c0_i32_0 = arith.constant 0 : i32
    return %arg0, %c0_i32 : i32, i32
  }
}

</mosaic_0001>

<bundles_post_ra>
// kernel: akconv_forward.1
= control target key start
LH: loop header
LB: loop body
LE: loop exit
PB: predicated region body
PF: predicated region fallthrough
CT: control target
= control target key end

     0   :  { %s1919_s21 = smov 0   ;;  %s2253_s0 = inlined_call_operand.vmem [shape: bf16[512,128], index: 0, kind: input, shape index: {}]   ;;  %s2254_s1 = inlined_call_operand.vmem [shape: bf16[512,128], index: 1, kind: input, shape index: {}]   ;;  %s2255_s2 = inlined_call_operand.vmem [shape: bf16[512,128], index: 2, kind: input, shape index: {}]   ;;  %s2256_s3 = inlined_call_operand.vmem [shape: bf16[512,128], index: 3, kind: input, shape index: {}]   ;;  %s2257_s4 = inlined_call_operand.vmem [shape: bf16[128,128], index: 4, kind: input, shape index: {}]   ;;  %s2258_s5 = inlined_call_operand.vmem [shape: f32[1,128], index: 5, kind: input, shape index: {}]   ;;  %s2259_s6 = inlined_call_operand.vmem [shape: f32[512,128], index: 6, kind: output, shape index: {}]  }
   0x1 LB: > { %s1270_s22 = sadd.s32 4294967295, %s1882_s21   ;;  %p1274_p0 = scmp.ge.s32.totalorder %s1882_s21, 1  ;;  %s1882_s21 = sphi %s1919_s21, %s16_s21  }
   0x2   : > { %p246_p1 = scmp.lt.s32.totalorder %s1882_s21, 3 }
   0x4   : > { %p247_p2 = pnand %p1274_p0, %p246_p1 }
   0x5   : > { %s1275_s25 = sshll.u32 (!%p247_p2), %s1270_s22, 5 }
   0x6   : > { %250 = sbr.rel (%p247_p2) target bundleno = 331 (0x14b), region = 44  ;;  %p292_p3 = scmp.lt.s32.totalorder (!%p247_p2), %s1275_s25, 63 }
   0xb   : > { %v1740_v0 = vld [vmem:[%s2257_s4 + $0x38] sm:$0xff]   ;;  %v1741_v1 = vld [vmem:[%s2257_s4 + $0x30] sm:$0xff]   ;;  %s2261_s25 = smov (!%p292_p3, %s1275_s25), 63  ;;  %v1742_v2 = vld [vmem:[%s2257_s4 + $0x28] sm:$0xff]  }
   0xc   : > { %1668 = vmatprep.subr.bf16.mxu0 %v1740_v0  ;;  %1716 = vmatprep.subr.bf16.mxu1 %v1740_v0  ;;  %s1276_s30 = sshll.u32 %s2261_s25, 2  ;;  %v1743_v3 = vld [vmem:[%s2257_s4 + $0x20] sm:$0xff]   ;;  %v1744_v25 = vld [vmem:[%s2257_s4 + $0x18] sm:$0xff]   ;;  %v1745_v46 = vld [vmem:[%s2257_s4 + $0x10] sm:$0xff]  }
   0xd   : > { %1669 = vmatpush3.bf16.msra.mxu0 %v1740_v0  ;;  %1724 = vmatpush3.bf16.msra.mxu1 %v1740_v0  ;;  %s1942_s9 = scalar_lea.vmem %s2253_s0, %s1276_s30  ;;  %s1947_s12 = scalar_lea.vmem %s2254_s1, %s1276_s30 }
   0xe   : > { %1670 = vmatprep.subr.bf16.mxu0 %v1741_v1  ;;  %1717 = vmatprep.subr.bf16.mxu1 %v1741_v1  ;;  %s1955_s17 = scalar_lea.vmem %s2255_s2, %s1276_s30  ;;  %s1960_s20 = scalar_lea.vmem %s2256_s3, %s1276_s30  ;;  %v1329_v4 = vld [vmem:[%s1942_s9] sm:$0xff]   ;;  %v1584_v24 = vld [vmem:[%s1942_s9 + $0x8] sm:$0xff]  }
   0xf   : > { %v1393_v5 = vld [vmem:[%s1947_s12] sm:$0xff]   ;;  %v1330_v7 = vunpack.c.l.bf16 %v1329_v4  ;;  %v1331_v8 = vunpack.c.h.bf16 %v1329_v4  ;;  %v1599_v30 = vld [vmem:[%s1947_s12 + $0x8] sm:$0xff]   ;;  %v1334_v38 = vunpack.c.l.bf16 %v1584_v24  ;;  %v1335_v39 = vunpack.c.h.bf16 %v1584_v24  ;;  %v1608_v24 = vld [vmem:[%s1947_s12 + $0x50] sm:$0xff]  }
  0x10   : > { %v1457_v6 = vld [vmem:[%s1955_s17] sm:$0xff]   ;;  %v1394_v9 = vunpack.c.l.bf16 %v1393_v5  ;;  %v1395_v10 = vunpack.c.h.bf16 %v1393_v5  ;;  %v1614_v35 = vld [vmem:[%s1955_s17 + $0x8] sm:$0xff]   ;;  %v1398_v43 = vunpack.c.l.bf16 %v1599_v30  ;;  %v1399_v44 = vunpack.c.h.bf16 %v1599_v30  ;;  %v1623_v30 = vld [vmem:[%s1955_s17 + $0x50] sm:$0xff]  }
  0x11   : > { %1671 = vmatpush3.bf16.msra.mxu0 %v1741_v1  ;;  %1725 = vmatpush3.bf16.msra.mxu1 %v1741_v1  ;;  %v1521_v11 = vld [vmem:[%s1960_s20] sm:$0xff]   ;;  %v1458_v14 = vunpack.c.l.bf16 %v1457_v6  ;;  %v1459_v15 = vunpack.c.h.bf16 %v1457_v6  ;;  %v1629_v40 = vld [vmem:[%s1960_s20 + $0x8] sm:$0xff]   ;;  %v1462_v49 = vunpack.c.l.bf16 %v1614_v35  ;;  %v1463_v50 = vunpack.c.h.bf16 %v1614_v35  ;;  %v1638_v35 = vld [vmem:[%s1960_s20 + $0x50] sm:$0xff]  }
  0x12   : > { %1672 = vmatprep.subr.bf16.mxu0 %v1742_v2  ;;  %1718 = vmatprep.subr.bf16.mxu1 %v1742_v2  ;;  %v1591_v12 = vld [vmem:[%s1942_s9 + $0x40] sm:$0xff]   ;;  %v1522_v16 = vunpack.c.l.bf16 %v1521_v11  ;;  %v1523_v17 = vunpack.c.h.bf16 %v1521_v11  ;;  %v450_v20 = vadd.f32 %v1394_v9, %v1330_v7  ;;  %v451_v21 = vadd.f32 %v1395_v10, %v1331_v8  ;;  %v1592_v45 = vld [vmem:[%s1942_s9 + $0x48] sm:$0xff]   ;;  %v1600_v8 = vld [vmem:[%s1947_s12 + $0x10] sm:$0xff]  }
  0x13   : > { %v1606_v13 = vld [vmem:[%s1947_s12 + $0x40] sm:$0xff]   ;;  %v1362_v22 = vunpack.c.l.bf16 %v1591_v12  ;;  %v1363_v23 = vunpack.c.h.bf16 %v1591_v12  ;;  %v1607_v51 = vld [vmem:[%s1947_s12 + $0x48] sm:$0xff]   ;;  %v452_v53 = vadd.f32 %v1398_v43, %v1334_v38  ;;  %v453_v54 = vadd.f32 %v1399_v44, %v1335_v39  ;;  %v1586_v44 = vld [vmem:[%s1942_s9 + $0x18] sm:$0xff]  }
  0x14   : > { %v1621_v18 = vld [vmem:[%s1955_s17 + $0x40] sm:$0xff]   ;;  %v1426_v26 = vunpack.c.l.bf16 %v1606_v13  ;;  %v1427_v27 = vunpack.c.h.bf16 %v1606_v13  ;;  %v546_v31 = vadd.f32 %v1458_v14, %v450_v20  ;;  %v547_v32 = vadd.f32 %v1459_v15, %v451_v21  ;;  %v1622_v56 = vld [vmem:[%s1955_s17 + $0x48] sm:$0xff]   ;;  %v1615_v13 = vld [vmem:[%s1955_s17 + $0x10] sm:$0xff]  }
  0x15   : > { %v1636_v19 = vld [vmem:[%s1960_s20 + $0x40] sm:$0xff]   ;;  %1673 = vmatpush3.bf16.msra.mxu0 %v1742_v2  ;;  %1726 = vmatpush3.bf16.msra.mxu1 %v1742_v2  ;;  %v1490_v28 = vunpack.c.l.bf16 %v1621_v18  ;;  %v1491_v29 = vunpack.c.h.bf16 %v1621_v18  ;;  %v1526_v55 = vunpack.c.l.bf16 %v1629_v40  ;;  %v1527_v59 = vunpack.c.h.bf16 %v1629_v40  ;;  %v1637_v61 = vld [vmem:[%s1960_s20 + $0x48] sm:$0xff]   ;;  %v1585_v2 = vld [vmem:[%s1942_s9 + $0x10] sm:$0xff]  }
  0x16   : > { %1674 = vmatprep.subr.bf16.mxu0 %v1743_v3  ;;  %1719 = vmatprep.subr.bf16.mxu1 %v1743_v3  ;;  %v1554_v33 = vunpack.c.l.bf16 %v1636_v19  ;;  %v1555_v34 = vunpack.c.h.bf16 %v1636_v19  ;;  %v466_v36 = vadd.f32 %v1426_v26, %v1362_v22  ;;  %v467_v37 = vadd.f32 %v1427_v27, %v1363_v23  ;;  %v1630_v14 = vld [vmem:[%s1960_s20 + $0x10] sm:$0xff]  }
  0x17   : > { %v642_v41 = vadd.f32 %v1522_v16, %v546_v31  ;;  %v643_v42 = vadd.f32 %v1523_v17, %v547_v32  ;;  %v1366_v60 = vunpack.c.l.bf16 %v1592_v45  ;;  %v548_v62 = vadd.f32 %v1462_v49, %v452_v53  ;;  %v1593_v23 = vld [vmem:[%s1942_s9 + $0x50] sm:$0xff]  }
  0x18   : > { %v562_v47 = vadd.f32 %v1490_v28, %v466_v36  ;;  %v563_v48 = vadd.f32 %v1491_v29, %v467_v37  ;;  %v549_v63 = vadd.f32 %v1463_v50, %v453_v54  ;;  %v1367_v0 = vunpack.c.h.bf16 %v1592_v45  ;;  %v1601_v45 = vld [vmem:[%s1947_s12 + $0x18] sm:$0xff]  }
  0x19   : > { %1675 = vmatpush3.bf16.msra.mxu0 %v1743_v3  ;;  %1727 = vmatpush3.bf16.msra.mxu1 %v1743_v3  ;;  %v674_v52 = vpack.c.bf16 %v643_v42, %v642_v41  ;;  %v1430_v1 = vunpack.c.l.bf16 %v1607_v51  ;;  %v1746_v3 = vld [vmem:[%s2257_s4 + $0x8] sm:$0xff]   ;;  %v1431_v5 = vunpack.c.h.bf16 %v1607_v51  ;;  %v1494_v6 = vunpack.c.l.bf16 %v1622_v56  ;;  %v1616_v50 = vld [vmem:[%s1955_s17 + $0x18] sm:$0xff]  }
  0x1a   : > { %1676 = vmatprep.subr.bf16.mxu0 %v1744_v25  ;;  %1720 = vmatprep.subr.bf16.mxu1 %v1744_v25  ;;  %v658_v57 = vadd.f32 %v1554_v33, %v562_v47  ;;  %v659_v58 = vadd.f32 %v1555_v34, %v563_v48  ;;  %v1495_v7 = vunpack.c.h.bf16 %v1622_v56  ;;  %v1989_v9 = vadd.f32 %v1526_v55, %v548_v62  ;;  %v1631_v55 = vld [vmem:[%s1960_s20 + $0x18] sm:$0xff]  }
  0x1b   : > { %1684 = vmatprep.mubr.bf16.mxu0 %v674_v52  ;;  %v1991_v10 = vadd.f32 %v1527_v59, %v549_v63  ;;  %v468_v11 = vadd.f32 %v1430_v1, %v1366_v60  ;;  %v1558_v12 = vunpack.c.l.bf16 %v1637_v61  ;;  %v469_v15 = vadd.f32 %v1431_v5, %v1367_v0  ;;  %v1594_v60 = vld [vmem:[%s1942_s9 + $0x58] sm:$0xff]  }
  0x1c   : > { %v682_v4 = vpack.c.bf16 %v659_v58, %v658_v57  ;;  %v1559_v16 = vunpack.c.h.bf16 %v1637_v61  ;;  %v1338_v17 = vunpack.c.l.bf16 %v1585_v2  ;;  %v1339_v18 = vunpack.c.h.bf16 %v1585_v2  ;;  %v1609_v1 = vld [vmem:[%s1947_s12 + $0x58] sm:$0xff]  }
  0x1d   : > { %1677 = vmatpush3.bf16.msra.mxu0 %v1744_v25  ;;  %1728 = vmatpush3.bf16.msra.mxu1 %v1744_v25  ;;  %v675_v19 = vpack.c.bf16 %v1991_v10, %v1989_v9  ;;  %v564_v20 = vadd.f32 %v1494_v6, %v468_v11  ;;  %v1402_v21 = vunpack.c.l.bf16 %v1600_v8  ;;  %v1403_v22 = vunpack.c.h.bf16 %v1600_v8  ;;  %v1747_v25 = vld [vmem:[%s2257_s4] sm:$0xff]   ;;  %v1624_v6 = vld [vmem:[%s1955_s17 + $0x58] sm:$0xff]  }
  0x1e   : > { %1678 = vmatprep.subr.bf16.mxu0 %v1745_v46  ;;  %1721 = vmatprep.subr.bf16.mxu1 %v1745_v46  ;;  %v565_v26 = vadd.f32 %v1495_v7, %v469_v15  ;;  %v1466_v27 = vunpack.c.l.bf16 %v1615_v13  ;;  %v1467_v28 = vunpack.c.h.bf16 %v1615_v13  ;;  %v1530_v29 = vunpack.c.l.bf16 %v1630_v14  ;;  %v1639_v13 = vld [vmem:[%s1960_s20 + $0x58] sm:$0xff]  }
  0x1f   : > { %1700 = vmatprep.mubr.bf16.mxu1 %v682_v4  ;;  %v660_v31 = vadd.f32 %v1558_v12, %v564_v20  ;;  %v454_v32 = vadd.f32 %v1402_v21, %v1338_v17  ;;  %v455_v33 = vadd.f32 %v1403_v22, %v1339_v18  ;;  %v1531_v34 = vunpack.c.h.bf16 %v1630_v14  ;;  %v1587_v18 = vld [vmem:[%s1942_s9 + $0x20] sm:$0xff]  }
  0x20   : > { %v661_v36 = vadd.f32 %v1559_v16, %v565_v26  ;;  %v1370_v37 = vunpack.c.l.bf16 %v1593_v23  ;;  %v1371_v38 = vunpack.c.h.bf16 %v1593_v23  ;;  %v1434_v39 = vunpack.c.l.bf16 %v1608_v24 }
  0x21   : > { %1679 = vmatpush3.bf16.msra.mxu0 %v1745_v46  ;;  %1729 = vmatpush3.bf16.msra.mxu1 %v1745_v46  ;;  %v550_v40 = vadd.f32 %v1466_v27, %v454_v32  ;;  %v551_v41 = vadd.f32 %v1467_v28, %v455_v33  ;;  %v1435_v42 = vunpack.c.h.bf16 %v1608_v24  ;;  %v1498_v43 = vunpack.c.l.bf16 %v1623_v30  ;;  %v1602_v24 = vld [vmem:[%s1947_s12 + $0x20] sm:$0xff]  }
  0x22   : > { %1680 = vmatprep.subr.bf16.mxu0 %v1746_v3  ;;  %1722 = vmatprep.subr.bf16.mxu1 %v1746_v3  ;;  %v683_v46 = vpack.c.bf16 %v661_v36, %v660_v31  ;;  %v470_v47 = vadd.f32 %v1434_v39, %v1370_v37  ;;  %v1499_v48 = vunpack.c.h.bf16 %v1623_v30  ;;  %v1562_v49 = vunpack.c.l.bf16 %v1638_v35  ;;  %v1632_v27 = vld [vmem:[%s1960_s20 + $0x20] sm:$0xff]  }
  0x23   : > { %v646_v51 = vadd.f32 %v1530_v29, %v550_v40  ;;  %v647_v52 = vadd.f32 %v1531_v34, %v551_v41  ;;  %v471_v53 = vadd.f32 %v1435_v42, %v1371_v38  ;;  %v1563_v54 = vunpack.c.h.bf16 %v1638_v35  ;;  %v1595_v36 = vld [vmem:[%s1942_s9 + $0x60] sm:$0xff]  }
  0x24   : > { %v566_v56 = vadd.f32 %v1498_v43, %v470_v47  ;;  %v1342_v57 = vunpack.c.l.bf16 %v1586_v44  ;;  %v1343_v58 = vunpack.c.h.bf16 %v1586_v44  ;;  %v1406_v59 = vunpack.c.l.bf16 %v1601_v45  ;;  %v1610_v37 = vld [vmem:[%s1947_s12 + $0x60] sm:$0xff]  }
  0x25   : > { %1681 = vmatpush3.bf16.msra.mxu0 %v1746_v3  ;;  %1730 = vmatpush3.bf16.msra.mxu1 %v1746_v3  ;;  %v676_v61 = vpack.c.bf16 %v647_v52, %v646_v51  ;;  %v567_v62 = vadd.f32 %v1499_v48, %v471_v53  ;;  %v1407_v63 = vunpack.c.h.bf16 %v1601_v45  ;;  %v1470_v0 = vunpack.c.l.bf16 %v1616_v50  ;;  %v1640_v47 = vld [vmem:[%s1960_s20 + $0x60] sm:$0xff]  }
  0x26   : > { %1682 = vmatprep.subr.bf16.mxu0 %v1747_v25  ;;  %1723 = vmatprep.subr.bf16.mxu1 %v1747_v25  ;;  %v662_v2 = vadd.f32 %v1562_v49, %v566_v56  ;;  %v456_v3 = vadd.f32 %v1406_v59, %v1342_v57  ;;  %v1471_v4 = vunpack.c.h.bf16 %v1616_v50  ;;  %v1534_v5 = vunpack.c.l.bf16 %v1631_v55  ;;  %v1588_v56 = vld [vmem:[%s1942_s9 + $0x28] sm:$0xff]  }
  0x27   : > { %v663_v7 = vadd.f32 %v1563_v54, %v567_v62  ;;  %v457_v8 = vadd.f32 %v1407_v63, %v1343_v58  ;;  %v1535_v11 = vunpack.c.h.bf16 %v1631_v55  ;;  %v1374_v12 = vunpack.c.l.bf16 %v1594_v60  ;;  %v1603_v57 = vld [vmem:[%s1947_s12 + $0x28] sm:$0xff]  }
  0x28   : > { %v552_v14 = vadd.f32 %v1470_v0, %v456_v3  ;;  %v1375_v15 = vunpack.c.h.bf16 %v1594_v60  ;;  %v1438_v16 = vunpack.c.l.bf16 %v1609_v1  ;;  %v1439_v17 = vunpack.c.h.bf16 %v1609_v1  ;;  %v1618_v62 = vld [vmem:[%s1955_s17 + $0x28] sm:$0xff]  }
  0x29   : > { %1683 = vmatpush3.bf16.msra.mxu0 %v1747_v25  ;;  %1731 = vmatpush3.bf16.msra.mxu1 %v1747_v25  ;;  %v684_v20 = vpack.c.bf16 %v663_v7, %v662_v2  ;;  %v553_v21 = vadd.f32 %v1471_v4, %v457_v8  ;;  %v1502_v22 = vunpack.c.l.bf16 %v1624_v6  ;;  %v1503_v23 = vunpack.c.h.bf16 %v1624_v6  ;;  %v1633_v3 = vld [vmem:[%s1960_s20 + $0x28] sm:$0xff]  }
  0x2a   : > { %v648_v25 = vadd.f32 %v1534_v5, %v552_v14  ;;  %v472_v26 = vadd.f32 %v1438_v16, %v1374_v12  ;;  %v473_v9 = vadd.f32 %v1439_v17, %v1375_v15  ;;  %v1566_v10 = vunpack.c.l.bf16 %v1639_v13  ;;  %v1596_v8 = vld [vmem:[%s1942_s9 + $0x68] sm:$0xff]  }
  0x2b   : > { %v649_v28 = vadd.f32 %v1535_v11, %v553_v21  ;;  %v1567_v29 = vunpack.c.h.bf16 %v1639_v13  ;;  %v1346_v30 = vunpack.c.l.bf16 %v1587_v18  ;;  %v1347_v31 = vunpack.c.h.bf16 %v1587_v18  ;;  %v1611_v15 = vld [vmem:[%s1947_s12 + $0x68] sm:$0xff]  }
  0x2c   : > { %1685 = vmatmul.mubr.bf16.vlgmr.msra.gmra.mxu0 %v675_v19  ;;  %1701 = vmatmul.mubr.bf16.vlgmr.msra.gmra.mxu1 %v683_v46  ;;  %v1617_v19 = vld [vmem:[%s1955_s17 + $0x20] sm:$0xff]   ;;  %v568_v32 = vadd.f32 %v1502_v22, %v472_v26  ;;  %v569_v33 = vadd.f32 %v1503_v23, %v473_v9  ;;  %v1410_v34 = vunpack.c.l.bf16 %v1602_v24  ;;  %v1411_v35 = vunpack.c.h.bf16 %v1602_v24  ;;  %v1626_v21 = vld [vmem:[%s1955_s17 + $0x68] sm:$0xff]  }
  0x2d   : > { %1688 = vmatprep.mubr.bf16.mxu0 %v676_v61  ;;  %1704 = vmatprep.mubr.bf16.mxu1 %v684_v20  ;;  %v677_v38 = vpack.c.bf16 %v649_v28, %v648_v25  ;;  %v1474_v39 = vunpack.c.l.bf16 %v1617_v19  ;;  %v1475_v40 = vunpack.c.h.bf16 %v1617_v19  ;;  %v1538_v41 = vunpack.c.l.bf16 %v1632_v27  ;;  %v1625_v46 = vld [vmem:[%s1955_s17 + $0x60] sm:$0xff]   ;;  %v1641_v26 = vld [vmem:[%s1960_s20 + $0x68] sm:$0xff]   ;;  %v1589_v28 = vld [vmem:[%s1942_s9 + $0x30] sm:$0xff]  }
  0x2e   : > { %v664_v42 = vadd.f32 %v1566_v10, %v568_v32  ;;  %v665_v43 = vadd.f32 %v1567_v29, %v569_v33  ;;  %v458_v44 = vadd.f32 %v1410_v34, %v1346_v30  ;;  %v459_v45 = vadd.f32 %v1411_v35, %v1347_v31  ;;  %v1604_v33 = vld [vmem:[%s1947_s12 + $0x30] sm:$0xff]  }
  0x2f   : > { %v1539_v48 = vunpack.c.h.bf16 %v1632_v27  ;;  %v1378_v49 = vunpack.c.l.bf16 %v1595_v36  ;;  %v1379_v50 = vunpack.c.h.bf16 %v1595_v36  ;;  %v1442_v51 = vunpack.c.l.bf16 %v1610_v37 }
  0x30   : > { %v685_v52 = vpack.c.bf16 %v665_v43, %v664_v42  ;;  %v554_v53 = vadd.f32 %v1474_v39, %v458_v44  ;;  %v555_v54 = vadd.f32 %v1475_v40, %v459_v45  ;;  %v1443_v55 = vunpack.c.h.bf16 %v1610_v37  ;;  %v1634_v39 = vld [vmem:[%s1960_s20 + $0x30] sm:$0xff]  }
  0x31   : > { %v474_v58 = vadd.f32 %v1442_v51, %v1378_v49  ;;  %v1506_v59 = vunpack.c.l.bf16 %v1625_v46  ;;  %v1507_v60 = vunpack.c.h.bf16 %v1625_v46  ;;  %v1570_v61 = vunpack.c.l.bf16 %v1640_v47  ;;  %v1612_v49 = vld [vmem:[%s1947_s12 + $0x70] sm:$0xff]  }
  0x32   : > { %v650_v63 = vadd.f32 %v1538_v41, %v554_v53  ;;  %v651_v0 = vadd.f32 %v1539_v48, %v555_v54  ;;  %v475_v1 = vadd.f32 %v1443_v55, %v1379_v50  ;;  %v1571_v2 = vunpack.c.h.bf16 %v1640_v47  ;;  %v1597_v48 = vld [vmem:[%s1942_s9 + $0x70] sm:$0xff]  }
  0x33   : > { %v570_v4 = vadd.f32 %v1506_v59, %v474_v58  ;;  %v1350_v5 = vunpack.c.l.bf16 %v1588_v56  ;;  %v1351_v6 = vunpack.c.h.bf16 %v1588_v56  ;;  %v1414_v7 = vunpack.c.l.bf16 %v1603_v57  ;;  %v1627_v58 = vld [vmem:[%s1955_s17 + $0x70] sm:$0xff]  }
  0x34   : > { %1689 = vmatmul.mubr.bf16.gmra.mxu0 %v677_v38  ;;  %1705 = vmatmul.mubr.bf16.gmra.mxu1 %v685_v52  ;;  %v678_v11 = vpack.c.bf16 %v651_v0, %v650_v63  ;;  %v571_v12 = vadd.f32 %v1507_v60, %v475_v1  ;;  %v1415_v13 = vunpack.c.h.bf16 %v1603_v57  ;;  %v1478_v14 = vunpack.c.l.bf16 %v1618_v62  ;;  %v1619_v38 = vld [vmem:[%s1955_s17 + $0x30] sm:$0xff]  }
  0x35   : > { %v666_v16 = vadd.f32 %v1570_v61, %v570_v4  ;;  %v460_v17 = vadd.f32 %v1414_v7, %v1350_v5  ;;  %v1479_v18 = vunpack.c.h.bf16 %v1618_v62  ;;  %v1542_v20 = vunpack.c.l.bf16 %v1633_v3  ;;  %v1642_v59 = vld [vmem:[%s1960_s20 + $0x70] sm:$0xff]   ;;  %v1590_v4 = vld [vmem:[%s1942_s9 + $0x38] sm:$0xff]  }
  0x36   : > { %1692 = vmatprep.mubr.bf16.mxu0 %v678_v11  ;;  %v667_v22 = vadd.f32 %v1571_v2, %v571_v12  ;;  %v461_v23 = vadd.f32 %v1415_v13, %v1351_v6  ;;  %v1543_v24 = vunpack.c.h.bf16 %v1633_v3  ;;  %v1382_v25 = vunpack.c.l.bf16 %v1596_v8  ;;  %v1605_v5 = vld [vmem:[%s1947_s12 + $0x38] sm:$0xff]  }
  0x37   : > { %v556_v9 = vadd.f32 %v1478_v14, %v460_v17  ;;  %v1383_v10 = vunpack.c.h.bf16 %v1596_v8  ;;  %v1446_v19 = vunpack.c.l.bf16 %v1611_v15  ;;  %v1447_v27 = vunpack.c.h.bf16 %v1611_v15  ;;  %v1620_v12 = vld [vmem:[%s1955_s17 + $0x38] sm:$0xff]  }
  0x38   : > { %v686_v29 = vpack.c.bf16 %v667_v22, %v666_v16  ;;  %v557_v30 = vadd.f32 %v1479_v18, %v461_v23  ;;  %v1510_v31 = vunpack.c.l.bf16 %v1626_v21  ;;  %v1511_v32 = vunpack.c.h.bf16 %v1626_v21  ;;  %v1635_v17 = vld [vmem:[%s1960_s20 + $0x38] sm:$0xff]  }
  0x39   : > { %v652_v34 = vadd.f32 %v1542_v20, %v556_v9  ;;  %v476_v35 = vadd.f32 %v1446_v19, %v1382_v25  ;;  %v477_v36 = vadd.f32 %v1447_v27, %v1383_v10  ;;  %v1574_v37 = vunpack.c.l.bf16 %v1641_v26  ;;  %v1598_v23 = vld [vmem:[%s1942_s9 + $0x78] sm:$0xff]   ;;  %s1284_s9 = sshll.u32 %s2261_s25, 3 }
  0x3a   : > { %1708 = vmatprep.mubr.bf16.mxu1 %v686_v29  ;;  %v653_v40 = vadd.f32 %v1543_v24, %v557_v30  ;;  %v1575_v41 = vunpack.c.h.bf16 %v1641_v26  ;;  %v1354_v42 = vunpack.c.l.bf16 %v1589_v28  ;;  %v1355_v43 = vunpack.c.h.bf16 %v1589_v28  ;;  %v1613_v10 = vld [vmem:[%s1947_s12 + $0x78] sm:$0xff]   ;;  %s2136_s11 = scalar_lea.vmem %s2259_s6, %s1284_s9 }
  0x3b   : > { %v572_v44 = vadd.f32 %v1510_v31, %v476_v35  ;;  %v573_v45 = vadd.f32 %v1511_v32, %v477_v36  ;;  %v1418_v46 = vunpack.c.l.bf16 %v1604_v33  ;;  %v1419_v47 = vunpack.c.h.bf16 %v1604_v33  ;;  %v1628_v30 = vld [vmem:[%s1955_s17 + $0x78] sm:$0xff]  }
  0x3c   : > { %v679_v50 = vpack.c.bf16 %v653_v40, %v652_v34  ;;  %v1482_v51 = vunpack.c.l.bf16 %v1619_v38  ;;  %v1483_v52 = vunpack.c.h.bf16 %v1619_v38  ;;  %v1546_v53 = vunpack.c.l.bf16 %v1634_v39  ;;  %v1643_v35 = vld [vmem:[%s1960_s20 + $0x78] sm:$0xff]  }
  0x3d   : > { %v668_v54 = vadd.f32 %v1574_v37, %v572_v44  ;;  %v669_v55 = vadd.f32 %v1575_v41, %v573_v45  ;;  %v462_v56 = vadd.f32 %v1418_v46, %v1354_v42  ;;  %v463_v57 = vadd.f32 %v1419_v47, %v1355_v43 }
  0x3e   : > { %1693 = vmatmul.mubr.bf16.gmra.mxu0 %v679_v50  ;;  %v1547_v60 = vunpack.c.h.bf16 %v1634_v39  ;;  %v1386_v61 = vunpack.c.l.bf16 %v1597_v48  ;;  %v1387_v62 = vunpack.c.h.bf16 %v1597_v48  ;;  %v1450_v63 = vunpack.c.l.bf16 %v1612_v49 }
  0x3f   : > { %v687_v0 = vpack.c.bf16 %v669_v55, %v668_v54  ;;  %v558_v1 = vadd.f32 %v1482_v51, %v462_v56  ;;  %v559_v2 = vadd.f32 %v1483_v52, %v463_v57  ;;  %v1451_v3 = vunpack.c.h.bf16 %v1612_v49  ;;  %v2050_v56 = vld [vmem:[%s2258_s5] ss:$0 sm:$0xff] }
  0x40   : > { %v478_v6 = vadd.f32 %v1450_v63, %v1386_v61  ;;  %v1514_v7 = vunpack.c.l.bf16 %v1627_v58  ;;  %v1515_v8 = vunpack.c.h.bf16 %v1627_v58  ;;  %v1578_v11 = vunpack.c.l.bf16 %v1642_v59 }
  0x41   : > { %1709 = vmatmul.mubr.bf16.gmra.mxu1 %v687_v0  ;;  %v654_v13 = vadd.f32 %v1546_v53, %v558_v1  ;;  %v655_v14 = vadd.f32 %v1547_v60, %v559_v2  ;;  %v479_v15 = vadd.f32 %v1451_v3, %v1387_v62  ;;  %v1579_v16 = vunpack.c.h.bf16 %v1642_v59 }
  0x42   : > { %v574_v18 = vadd.f32 %v1514_v7, %v478_v6  ;;  %v1358_v20 = vunpack.c.l.bf16 %v1590_v4  ;;  %v1359_v21 = vunpack.c.h.bf16 %v1590_v4  ;;  %v1422_v22 = vunpack.c.l.bf16 %v1605_v5 }
  0x43   : > { %v680_v24 = vpack.c.bf16 %v655_v14, %v654_v13  ;;  %v575_v25 = vadd.f32 %v1515_v8, %v479_v15  ;;  %v1423_v26 = vunpack.c.h.bf16 %v1605_v5  ;;  %v1486_v9 = vunpack.c.l.bf16 %v1620_v12 }
  0x44   : > { %v670_v19 = vadd.f32 %v1578_v11, %v574_v18  ;;  %v464_v27 = vadd.f32 %v1422_v22, %v1358_v20  ;;  %v1487_v28 = vunpack.c.h.bf16 %v1620_v12  ;;  %v1550_v29 = vunpack.c.l.bf16 %v1635_v17 }
  0x45   : > { %1696 = vmatprep.mubr.bf16.mxu0 %v680_v24  ;;  %v671_v31 = vadd.f32 %v1579_v16, %v575_v25  ;;  %v465_v32 = vadd.f32 %v1423_v26, %v1359_v21  ;;  %v1551_v33 = vunpack.c.h.bf16 %v1635_v17  ;;  %v1390_v34 = vunpack.c.l.bf16 %v1598_v23 }
  0x46   : > { %v560_v36 = vadd.f32 %v1486_v9, %v464_v27  ;;  %v1391_v37 = vunpack.c.h.bf16 %v1598_v23  ;;  %v1454_v38 = vunpack.c.l.bf16 %v1613_v10  ;;  %v1455_v39 = vunpack.c.h.bf16 %v1613_v10 }
  0x47   : > { %v688_v40 = vpack.c.bf16 %v671_v31, %v670_v19  ;;  %v561_v41 = vadd.f32 %v1487_v28, %v465_v32  ;;  %v1518_v42 = vunpack.c.l.bf16 %v1628_v30  ;;  %v1519_v43 = vunpack.c.h.bf16 %v1628_v30 }
  0x48   : > { %v656_v44 = vadd.f32 %v1550_v29, %v560_v36  ;;  %v480_v45 = vadd.f32 %v1454_v38, %v1390_v34  ;;  %v481_v46 = vadd.f32 %v1455_v39, %v1391_v37  ;;  %v1582_v47 = vunpack.c.l.bf16 %v1643_v35 }
  0x49   : > { %1712 = vmatprep.mubr.bf16.mxu1 %v688_v40  ;;  %v657_v48 = vadd.f32 %v1551_v33, %v561_v41  ;;  %v1583_v49 = vunpack.c.h.bf16 %v1643_v35 }
  0x4a   : > { %v576_v50 = vadd.f32 %v1518_v42, %v480_v45  ;;  %v577_v51 = vadd.f32 %v1519_v43, %v481_v46 }
  0x4b   : > { %v681_v52 = vpack.c.bf16 %v657_v48, %v656_v44 }
  0x4c   : > { %v672_v53 = vadd.f32 %v1582_v47, %v576_v50  ;;  %v673_v54 = vadd.f32 %v1583_v49, %v577_v51 }
  0x4d   : > { %1697 = vmatmul.mubr.bf16.gmra.mxu0 %v681_v52 }
  0x4e   : > { %v689_v55 = vpack.c.bf16 %v673_v54, %v672_v53 }
  0x50   : > { %1713 = vmatmul.mubr.bf16.gmra.mxu1 %v689_v55 }
  0xec   : > { %v1686_v57 = vpop.f32.mrf.mxu0  ;;  %v1702_v58 = vpop.f32.mrf.mxu1 }
  0xed   : > { %v2053_v59 = vadd.f32 %v1686_v57, %v2050_v56  ;;  %v2056_v60 = vadd.f32 %v1702_v58, %v2050_v56 }
  0xee   : > { %v795_v61 = vpop.f32.mrf.mxu0  ;;  %v859_v62 = vpop.f32.mrf.mxu1 }
  0xef   : > { %v1296_v63 = vmul.f32 -1.442695, %v2053_v59  ;;  %v1312_v0 = vmul.f32 -1.442695, %v2056_v60  ;;  %v2061_v1 = vadd.f32 %v2050_v56, %v795_v61  ;;  %v2064_v2 = vadd.f32 %v2050_v56, %v859_v62 }
  0xf0   : > { %v1687_v3 = vpop.f32.mrf.mxu0  ;;  %v1703_v4 = vpop.f32.mrf.mxu1 }
  0xf1   : > { %1748 = vpow2.f32 %v1296_v63  ;;  %v1294_v5 = vmul.f32 -1.442695, %v2061_v1  ;;  %v1310_v6 = vmul.f32 -1.442695, %v2064_v2  ;;  %v2069_v7 = vadd.f32 %v1687_v3, %v2050_v56 }
  0xf2   : > { %1750 = vpow2.f32 %v1312_v0  ;;  %v2072_v8 = vadd.f32 %v1703_v4, %v2050_v56  ;;  %v798_v11 = vpop.f32.mrf.mxu0  ;;  %v862_v12 = vpop.f32.mrf.mxu1 }
  0xf3   : > { %1752 = vpow2.f32 %v1294_v5  ;;  %v1297_v13 = vmul.f32 -1.442695, %v2069_v7  ;;  %v2076_v14 = vadd.f32 %v2050_v56, %v798_v11  ;;  %v2079_v15 = vadd.f32 %v2050_v56, %v862_v12 }
  0xf4   : > { %1754 = vpow2.f32 %v1310_v6  ;;  %v1313_v16 = vmul.f32 -1.442695, %v2072_v8  ;;  %v1690_v17 = vpop.f32.mrf.mxu0  ;;  %v1706_v22 = vpop.f32.mrf.mxu1 }
  0xf5   : > { %1756 = vpow2.f32 %v1297_v13  ;;  %v1295_v18 = vmul.f32 -1.442695, %v2076_v14  ;;  %v1311_v20 = vmul.f32 -1.442695, %v2079_v15  ;;  %v2085_v21 = vadd.f32 %v1690_v17, %v2050_v56 }
  0xf6   : > { %1758 = vpow2.f32 %v1313_v16  ;;  %v811_v23 = vpop.f32.mrf.mxu0  ;;  %v2089_v25 = vadd.f32 %v1706_v22, %v2050_v56  ;;  %v875_v9 = vpop.f32.mrf.mxu1 }
  0xf7   : > { %1760 = vpow2.f32 %v1295_v18  ;;  %v1300_v24 = vmul.f32 -1.442695, %v2085_v21  ;;  %v2092_v26 = vadd.f32 %v2050_v56, %v811_v23  ;;  %v2097_v28 = vadd.f32 %v2050_v56, %v875_v9 }
  0xf8   : > { %1762 = vpow2.f32 %v1311_v20  ;;  %v1691_v10 = vpop.f32.mrf.mxu0  ;;  %v1316_v19 = vmul.f32 -1.442695, %v2089_v25  ;;  %v1707_v30 = vpop.f32.mrf.mxu1 }
  0xf9   : > { %1764 = vpow2.f32 %v1300_v24  ;;  %v1298_v27 = vmul.f32 -1.442695, %v2092_v26  ;;  %v2100_v29 = vadd.f32 %v1691_v10, %v2050_v56  ;;  %v1314_v32 = vmul.f32 -1.442695, %v2097_v28 }
  0xfa   : > { %v814_v31 = vpop.f32.mrf.mxu0  ;;  %1766 = vpow2.f32 %v1316_v19  ;;  %v2104_v33 = vadd.f32 %v1707_v30, %v2050_v56  ;;  %v878_v41 = vpop.f32.mrf.mxu1 }
  0xfb   : > { %v2107_v34 = vadd.f32 %v2050_v56, %v814_v31  ;;  %1768 = vpow2.f32 %v1298_v27  ;;  %v1301_v35 = vmul.f32 -1.442695, %v2100_v29  ;;  %v2113_v48 = vadd.f32 %v2050_v56, %v878_v41 }
  0xfc   : > { %1770 = vpow2.f32 %v1314_v32  ;;  %v1317_v36 = vmul.f32 -1.442695, %v2104_v33 }
  0xfd   : > { %v1299_v37 = vmul.f32 -1.442695, %v2107_v34  ;;  %1772 = vpow2.f32 %v1301_v35  ;;  %v1315_v63 = vmul.f32 -1.442695, %v2113_v48 }
  0xfe   : > { %v1749_v38 = vpop.eup %1748  ;;  %1774 = vpow2.f32 %v1317_v36  ;;  %v1694_v49 = vpop.f32.mrf.mxu0 }
  0xff   : > { %v1751_v39 = vpop.eup %1750  ;;  %v1020_v40 = vadd.f32 1.0, %v1749_v38  ;;  %1776 = vpow2.f32 %v1299_v37  ;;  %v2117_v12 = vadd.f32 %v1694_v49, %v2050_v56 }
 0x100   : > { %v1753_v42 = vpop.eup %1752  ;;  %v1036_v43 = vadd.f32 1.0, %v1751_v39  ;;  %v827_v54 = vpop.f32.mrf.mxu0 }
 0x101   : > { %v1755_v44 = vpop.eup %1754  ;;  %1778 = vrcp.f32 %v1020_v40  ;;  %v1018_v45 = vadd.f32 1.0, %v1753_v42  ;;  %v1710_v58 = vpop.f32.mrf.mxu1  ;;  %v2124_v23 = vadd.f32 %v2050_v56, %v827_v54  ;;  %v1304_v31 = vmul.f32 -1.442695, %v2117_v12 }
 0x102   : > { %v1757_v46 = vpop.eup %1756  ;;  %1780 = vrcp.f32 %v1036_v43  ;;  %v1034_v47 = vadd.f32 1.0, %v1755_v44  ;;  %v1695_v5 = vpop.f32.mrf.mxu0  ;;  %v2120_v18 = vadd.f32 %v1710_v58, %v2050_v56 }
 0x103   : > { %v1759_v50 = vpop.eup %1758  ;;  %1782 = vrcp.f32 %v1018_v45  ;;  %v1021_v51 = vadd.f32 1.0, %v1757_v46  ;;  %v891_v3 = vpop.f32.mrf.mxu1  ;;  %v2131_v32 = vadd.f32 %v1695_v5, %v2050_v56  ;;  %v1302_v42 = vmul.f32 -1.442695, %v2124_v23 }
 0x104   : > { %v1761_v52 = vpop.eup %1760  ;;  %1784 = vrcp.f32 %v1034_v47  ;;  %v1037_v53 = vadd.f32 1.0, %v1759_v50  ;;  %v2127_v10 = vadd.f32 %v2050_v56, %v891_v3  ;;  %v830_v19 = vpop.f32.mrf.mxu0  ;;  %v1320_v38 = vmul.f32 -1.442695, %v2120_v18 }
 0x105   : > { %v1763_v55 = vpop.eup %1762  ;;  %1786 = vrcp.f32 %v1021_v51  ;;  %v1019_v57 = vadd.f32 1.0, %v1761_v52  ;;  %v1711_v13 = vpop.f32.mrf.mxu1  ;;  %v2145_v43 = vadd.f32 %v2050_v56, %v830_v19  ;;  %v1305_v50 = vmul.f32 -1.442695, %v2131_v32 }
 0x106   : > { %v1765_v61 = vpop.eup %1764  ;;  %1788 = vrcp.f32 %v1037_v53  ;;  %v1035_v62 = vadd.f32 1.0, %v1763_v55  ;;  %v2140_v39 = vadd.f32 %v1711_v13, %v2050_v56  ;;  %v1318_v46 = vmul.f32 -1.442695, %v2127_v10 }
 0x107   : > { %1790 = vrcp.f32 %v1019_v57  ;;  %v1024_v0 = vadd.f32 1.0, %v1765_v61  ;;  %v1767_v4 = vpop.eup %1766  ;;  %v894_v35 = vpop.f32.mrf.mxu1  ;;  %v1303_v57 = vmul.f32 -1.442695, %v2145_v43 }
 0x108   : > { %1792 = vrcp.f32 %v1035_v62  ;;  %v1769_v6 = vpop.eup %1768  ;;  %v1040_v11 = vadd.f32 1.0, %v1767_v4  ;;  %v2150_v47 = vadd.f32 %v2050_v56, %v894_v35  ;;  %v1321_v53 = vmul.f32 -1.442695, %v2140_v39 }
 0x109   : > { %1794 = vrcp.f32 %v1024_v0  ;;  %v1771_v16 = vpop.eup %1770  ;;  %v1022_v17 = vadd.f32 1.0, %v1769_v6 }
 0x10a   : > { %1796 = vpow2.f32 %v1315_v63  ;;  %v1773_v20 = vpop.eup %1772  ;;  %v1038_v22 = vadd.f32 1.0, %v1771_v16  ;;  %v1319_v62 = vmul.f32 -1.442695, %v2150_v47 }
 0x10b   : > { %1798 = vrcp.f32 %v1040_v11  ;;  %v1775_v24 = vpop.eup %1774  ;;  %v1025_v9 = vadd.f32 1.0, %v1773_v20 }
 0x10c   : > { %1800 = vrcp.f32 %v1022_v17  ;;  %v1777_v27 = vpop.eup %1776  ;;  %v1041_v30 = vadd.f32 1.0, %v1775_v24 }
 0x10d   : > { %1802 = vrcp.f32 %v1038_v22  ;;  %v1023_v37 = vadd.f32 1.0, %v1777_v27  ;;  %v1698_v51 = vpop.f32.mrf.mxu0 }
 0x10e   : > { %v1779_v36 = vpop.eup %1778  ;;  %1804 = vrcp.f32 %v1025_v9  ;;  %v2159_v54 = vadd.f32 %v1698_v51, %v2050_v56 }
 0x10f   : > { %v1781_v40 = vpop.eup %1780  ;;  %v1116_v41 = vmul.f32 %v1779_v36, %v2053_v59  ;;  %1806 = vrcp.f32 %v1041_v30  ;;  %v843_v58 = vpop.f32.mrf.mxu0 }
 0x110   : > { %v1783_v44 = vpop.eup %1782  ;;  %v1132_v45 = vmul.f32 %v1781_v40, %v2056_v60  ;;  %1808 = vrcp.f32 %v1023_v37  ;;  %v1714_v63 = vpop.f32.mrf.mxu1  ;;  %v2168_v0 = vadd.f32 %v2050_v56, %v843_v58  ;;  %v1308_v4 = vmul.f32 -1.442695, %v2159_v54 }
 0x111   : > { %v1785_v49 = vpop.eup %1784  ;;  %1148 = vst [vmem:[%s2136_s11 + $0x10] sm:$0xff] %v1116_v41  ;;  %v1114_v59 = vmul.f32 %v1783_v44, %v2061_v1  ;;  %1810 = vpow2.f32 %v1304_v31  ;;  %v2174_v5 = vadd.f32 %v1714_v63, %v2050_v56 }
 0x112   : > { %v1787_v52 = vpop.eup %1786  ;;  %1164 = vst [vmem:[%s2136_s11 + $0x90] sm:$0xff] %v1132_v45  ;;  %v1130_v60 = vmul.f32 %v1785_v49, %v2064_v2  ;;  %1812 = vpow2.f32 %v1320_v38  ;;  %v907_v13 = vpop.f32.mrf.mxu1  ;;  %v1306_v19 = vmul.f32 -1.442695, %v2168_v0 }
 0x113   : > { %v1789_v55 = vpop.eup %1788  ;;  %1146 = vst [vmem:[%s2136_s11] sm:$0xff] %v1114_v59  ;;  %v1117_v1 = vmul.f32 %v1787_v52, %v2069_v7  ;;  %1814 = vpow2.f32 %v1302_v42  ;;  %v1324_v20 = vmul.f32 -1.442695, %v2174_v5  ;;  %v2185_v22 = vadd.f32 %v2050_v56, %v907_v13 }
 0x114   : > { %v1791_v61 = vpop.eup %1790  ;;  %1162 = vst [vmem:[%s2136_s11 + $0x80] sm:$0xff] %v1130_v60  ;;  %v1133_v2 = vmul.f32 %v1789_v55, %v2072_v8  ;;  %1816 = vpow2.f32 %v1318_v46  ;;  %v1699_v8 = vpop.f32.mrf.mxu0 }
 0x115   : > { %v1793_v3 = vpop.eup %1792  ;;  %1149 = vst [vmem:[%s2136_s11 + $0x18] sm:$0xff] %v1117_v1  ;;  %v1115_v7 = vmul.f32 %v1791_v61, %v2076_v14  ;;  %1818 = vpow2.f32 %v1305_v50  ;;  %v2179_v16 = vadd.f32 %v1699_v8, %v2050_v56  ;;  %v1715_v27 = vpop.f32.mrf.mxu1  ;;  %v1322_v35 = vmul.f32 -1.442695, %v2185_v22 }
 0x116   : > { %v1795_v6 = vpop.eup %1794  ;;  %1165 = vst [vmem:[%s2136_s11 + $0x98] sm:$0xff] %v1133_v2  ;;  %v1131_v11 = vmul.f32 %v1793_v3, %v2079_v15  ;;  %1820 = vpow2.f32 %v1321_v53  ;;  %v846_v24 = vpop.f32.mrf.mxu0  ;;  %v2196_v36 = vadd.f32 %v1715_v27, %v2050_v56 }
 0x117   : > { %v1797_v17 = vpop.eup %1796  ;;  %1147 = vst [vmem:[%s2136_s11 + $0x8] sm:$0xff] %v1115_v7  ;;  %v1120_v14 = vmul.f32 %v1795_v6, %v2085_v21  ;;  %1822 = vpow2.f32 %v1303_v57  ;;  %v2190_v30 = vadd.f32 %v2050_v56, %v846_v24  ;;  %v1309_v40 = vmul.f32 -1.442695, %v2179_v16  ;;  %v910_v52 = vpop.f32.mrf.mxu1 }
 0x118   : > { %v1799_v9 = vpop.eup %1798  ;;  %1163 = vst [vmem:[%s2136_s11 + $0x88] sm:$0xff] %v1131_v11  ;;  %v1039_v15 = vadd.f32 1.0, %v1797_v17  ;;  %1824 = vpow2.f32 %v1319_v62  ;;  %v2213_v57 = vadd.f32 %v2050_v56, %v910_v52 }
 0x119   : > { %v1801_v31 = vpop.eup %1800  ;;  %1152 = vst [vmem:[%s2136_s11 + $0x30] sm:$0xff] %v1120_v14  ;;  %v1136_v21 = vmul.f32 %v1799_v9, %v2089_v25  ;;  %1826 = vpow2.f32 %v1308_v4  ;;  %v1325_v25 = vmul.f32 -1.442695, %v2196_v36 }
 0x11a   : > { %v1803_v37 = vpop.eup %1802  ;;  %v1118_v38 = vmul.f32 %v1801_v31, %v2092_v26  ;;  %1828 = vrcp.f32 %v1039_v15  ;;  %v1307_v26 = vmul.f32 -1.442695, %v2190_v30  ;;  %v1323_v4 = vmul.f32 -1.442695, %v2213_v57 }
 0x11b   : > { %v1805_v41 = vpop.eup %1804  ;;  %1168 = vst [vmem:[%s2136_s11 + $0xb0] sm:$0xff] %v1136_v21  ;;  %v1134_v42 = vmul.f32 %v1803_v37, %v2097_v28  ;;  %1830 = vpow2.f32 %v1324_v20 }
 0x11c   : > { %v1807_v44 = vpop.eup %1806  ;;  %1150 = vst [vmem:[%s2136_s11 + $0x20] sm:$0xff] %v1118_v38  ;;  %v1121_v45 = vmul.f32 %v1805_v41, %v2100_v29  ;;  %1832 = vpow2.f32 %v1306_v19 }
 0x11d   : > { %v1809_v46 = vpop.eup %1808  ;;  %1166 = vst [vmem:[%s2136_s11 + $0xa0] sm:$0xff] %v1134_v42  ;;  %v1137_v49 = vmul.f32 %v1807_v44, %v2104_v33  ;;  %1834 = vpow2.f32 %v1322_v35 }
 0x11e   : > { %v1811_v59 = vpop.eup %1810  ;;  %1153 = vst [vmem:[%s2136_s11 + $0x38] sm:$0xff] %v1121_v45  ;;  %v1119_v28 = vmul.f32 %v1809_v46, %v2107_v34  ;;  %1836 = vpow2.f32 %v1309_v40 }
 0x11f   : > { %v1813_v50 = vpop.eup %1812  ;;  %1169 = vst [vmem:[%s2136_s11 + $0xb8] sm:$0xff] %v1137_v49  ;;  %v1028_v51 = vadd.f32 1.0, %v1811_v59  ;;  %1838 = vpow2.f32 %v1325_v25 }
 0x120   : > { %v1815_v29 = vpop.eup %1814  ;;  %1151 = vst [vmem:[%s2136_s11 + $0x28] sm:$0xff] %v1119_v28  ;;  %v1044_v60 = vadd.f32 1.0, %v1813_v50  ;;  %1840 = vpow2.f32 %v1307_v26 }
 0x121   : > { %v1817_v53 = vpop.eup %1816  ;;  %1842 = vrcp.f32 %v1028_v51  ;;  %v1026_v55 = vadd.f32 1.0, %v1815_v29 }
 0x122   : > { %v1819_v1 = vpop.eup %1818  ;;  %1844 = vrcp.f32 %v1044_v60  ;;  %v1042_v33 = vadd.f32 1.0, %v1817_v53 }
 0x123   : > { %v1821_v34 = vpop.eup %1820  ;;  %1846 = vrcp.f32 %v1026_v55  ;;  %v1029_v58 = vadd.f32 1.0, %v1819_v1 }
 0x124   : > { %v1823_v61 = vpop.eup %1822  ;;  %1848 = vrcp.f32 %v1042_v33  ;;  %v1045_v2 = vadd.f32 1.0, %v1821_v34 }
 0x125   : > { %v1825_v62 = vpop.eup %1824  ;;  %1850 = vrcp.f32 %v1029_v58  ;;  %v1027_v63 = vadd.f32 1.0, %v1823_v61 }
 0x126   : > { %v1827_v3 = vpop.eup %1826  ;;  %1852 = vrcp.f32 %v1045_v2  ;;  %v1043_v7 = vadd.f32 1.0, %v1825_v62 }
 0x127   : > { %v1829_v8 = vpop.eup %1828  ;;  %1854 = vrcp.f32 %v1027_v63  ;;  %v1032_v6 = vadd.f32 1.0, %v1827_v3 }
 0x128   : > { %v1831_v56 = vpop.eup %1830  ;;  %v1135_v11 = vmul.f32 %v1829_v8, %v2113_v48  ;;  %1856 = vrcp.f32 %v1043_v7 }
 0x129   : > { %v1833_v13 = vpop.eup %1832  ;;  %1858 = vrcp.f32 %v1032_v6  ;;  %v1048_v17 = vadd.f32 1.0, %v1831_v56 }
 0x12a   : > { %v1835_v14 = vpop.eup %1834  ;;  %1167 = vst [vmem:[%s2136_s11 + $0xa8] sm:$0xff] %v1135_v11  ;;  %v1030_v20 = vadd.f32 1.0, %v1833_v13  ;;  %1860 = vpow2.f32 %v1323_v4 }
 0x12b   : > { %v1837_v24 = vpop.eup %1836  ;;  %1862 = vrcp.f32 %v1048_v17  ;;  %v1046_v9 = vadd.f32 1.0, %v1835_v14 }
 0x12c   : > { %v1839_v15 = vpop.eup %1838  ;;  %1864 = vrcp.f32 %v1030_v20  ;;  %v1033_v19 = vadd.f32 1.0, %v1837_v24 }
 0x12d   : > { %v1841_v27 = vpop.eup %1840  ;;  %1866 = vrcp.f32 %v1046_v9  ;;  %v1049_v31 = vadd.f32 1.0, %v1839_v15 }
 0x12e   : > { %v1843_v48 = vpop.eup %1842  ;;  %1868 = vrcp.f32 %v1033_v19  ;;  %v1031_v21 = vadd.f32 1.0, %v1841_v27 }
 0x12f   : > { %v1845_v35 = vpop.eup %1844  ;;  %v1124_v37 = vmul.f32 %v1843_v48, %v2117_v12  ;;  %1870 = vrcp.f32 %v1049_v31 }
 0x130   : > { %v1847_v38 = vpop.eup %1846  ;;  %v1140_v40 = vmul.f32 %v1845_v35, %v2120_v18  ;;  %1872 = vrcp.f32 %v1031_v21 }
 0x131   : > { %v1849_v41 = vpop.eup %1848  ;;  %1156 = vst [vmem:[%s2136_s11 + $0x50] sm:$0xff] %v1124_v37  ;;  %v1122_v42 = vmul.f32 %v1847_v38, %v2124_v23 }
 0x132   : > { %v1851_v25 = vpop.eup %1850  ;;  %1172 = vst [vmem:[%s2136_s11 + $0xd0] sm:$0xff] %v1140_v40  ;;  %v1138_v44 = vmul.f32 %v1849_v41, %v2127_v10 }
 0x133   : > { %v1853_v45 = vpop.eup %1852  ;;  %1154 = vst [vmem:[%s2136_s11 + $0x40] sm:$0xff] %v1122_v42  ;;  %v1125_v12 = vmul.f32 %v1851_v25, %v2131_v32 }
 0x134   : > { %v1855_v26 = vpop.eup %1854  ;;  %1170 = vst [vmem:[%s2136_s11 + $0xc0] sm:$0xff] %v1138_v44  ;;  %v1141_v18 = vmul.f32 %v1853_v45, %v2140_v39 }
 0x135   : > { %v1857_v46 = vpop.eup %1856  ;;  %1157 = vst [vmem:[%s2136_s11 + $0x58] sm:$0xff] %v1125_v12  ;;  %v1123_v49 = vmul.f32 %v1855_v26, %v2145_v43 }
 0x136   : > { %v1859_v23 = vpop.eup %1858  ;;  %1173 = vst [vmem:[%s2136_s11 + $0xd8] sm:$0xff] %v1141_v18  ;;  %v1139_v59 = vmul.f32 %v1857_v46, %v2150_v47 }
 0x137   : > { %v1861_v10 = vpop.eup %1860  ;;  %1155 = vst [vmem:[%s2136_s11 + $0x48] sm:$0xff] %v1123_v49  ;;  %v1128_v28 = vmul.f32 %v1859_v23, %v2159_v54 }
 0x138   : > { %v1863_v32 = vpop.eup %1862  ;;  %1171 = vst [vmem:[%s2136_s11 + $0xc8] sm:$0xff] %v1139_v59  ;;  %v1047_v50 = vadd.f32 1.0, %v1861_v10 }
 0x139   : > { %v1865_v39 = vpop.eup %1864  ;;  %1160 = vst [vmem:[%s2136_s11 + $0x70] sm:$0xff] %v1128_v28  ;;  %v1144_v43 = vmul.f32 %v1863_v32, %v2174_v5 }
 0x13a   : > { %v1867_v51 = vpop.eup %1866  ;;  %v1126_v52 = vmul.f32 %v1865_v39, %v2168_v0  ;;  %1874 = vrcp.f32 %v1047_v50 }
 0x13b   : > { %v1869_v47 = vpop.eup %1868  ;;  %1176 = vst [vmem:[%s2136_s11 + $0xf0] sm:$0xff] %v1144_v43  ;;  %v1142_v54 = vmul.f32 %v1867_v51, %v2185_v22 }
 0x13c   : > { %v1871_v29 = vpop.eup %1870  ;;  %1158 = vst [vmem:[%s2136_s11 + $0x60] sm:$0xff] %v1126_v52  ;;  %v1129_v60 = vmul.f32 %v1869_v47, %v2179_v16 }
 0x13d   : > { %v1873_v53 = vpop.eup %1872  ;;  %1174 = vst [vmem:[%s2136_s11 + $0xe0] sm:$0xff] %v1142_v54  ;;  %v1145_v55 = vmul.f32 %v1871_v29, %v2196_v36 }
 0x13e   : > { %1161 = vst [vmem:[%s2136_s11 + $0x78] sm:$0xff] %v1129_v60  ;;  %v1127_v5 = vmul.f32 %v1873_v53, %v2190_v30 }
 0x13f   : > { %1177 = vst [vmem:[%s2136_s11 + $0xf8] sm:$0xff] %v1145_v55 }
 0x140   : > { %1159 = vst [vmem:[%s2136_s11 + $0x68] sm:$0xff] %v1127_v5 }
 0x147   : > { %v1875_v0 = vpop.eup %1874 }
 0x148   : > { %v1143_v1 = vmul.f32 %v1875_v0, %v2213_v57 }
 0x14a   : > { %1175 = vst [vmem:[%s2136_s11 + $0xe8] sm:$0xff] %v1143_v1 }
 0x14b PF: > { %s16_s21 = sadd.s32 1, %s1882_s21  }
 0x14c   : > { %p13_p4 = scmp.ge.s32.totalorder %s16_s21, 4  }
 0x14e   :  { %15 = sbr.rel (!%p13_p4) target bundleno = 1 (0x1), region = 83 }

</bundles_post_ra>
